<compile_context>
chip_gen: v7x
topology: tpu7x:2x2x1
jax: 0.10.0
libtpu: 0.0.40
codegen_flags: <defaults>
</compile_context>

<pallas_src>
import functools
import math

import jax
import jax.numpy as jnp
from jax.experimental import pallas as pl
from jax.experimental.pallas import tpu as pltpu

_LANE = 128
_STATS_ROWS = 8          # sublane rows per core-shard in the stats partial outputs
_NUM_CORE_SHARDS = 2     # v7x has 2 TensorCores; harmless loop split on v5e/v6e


def _round_down(a, b):
    return (a // b) * b


def _vmem_capacity_bytes():
    try:
        return int(pltpu.get_tpu_info().vmem_capacity_bytes)
    except Exception:
        return 64 << 20          # conservative default (v7x physical VMEM)


def _sublane_rows(dtype):
    # Packed-sublane tile height: 8 rows for 4-byte, 16 for 2-byte, 32 for 1-byte.
    return max(8, 32 // max(1, jnp.dtype(dtype).itemsize))


# -----------------------------------------------------------------------------
# Kernels
# -----------------------------------------------------------------------------
def _fused_kernel(x_ref, w_ref, o_ref, *, total_elems, eps):
    """Whole (folded) array in one VMEM block: stats + normalize in one HBM pass."""
    xb = x_ref[...].astype(jnp.float32)
    n = jnp.float32(total_elems)
    s = jnp.sum(xb)
    q = jnp.sum(xb * xb)
    mean = s / n
    var = q / n - mean * mean                        # population variance (unbiased=False)
    std = jnp.sqrt(jnp.maximum(var, 0.0))
    inv = 1.0 / (std + jnp.float32(eps))
    w_scaled = w_ref[...].astype(jnp.float32) * inv  # (1, L), broadcasts over rows
    o_ref[...] = (xb * w_scaled).astype(o_ref.dtype)


def _stats_kernel(x_ref, s_ref, q_ref, *, rows_total, tile_rows, tiles_per_core):
    """Streaming pass 1: accumulate sum(x), sum(x*x) into per-core-shard partials.

    Grid is (NUM_CORE_SHARDS, tiles_per_core): the first axis is "parallel"
    (megacore-shardable on v7x), the second is the resident-accumulator axis.
    The ragged tail tile (and any fully out-of-range shard step) is masked with
    the *logical* global row index, so no wrapper-side padding copy is needed.
    """
    c = pl.program_id(0)
    j = pl.program_id(1)

    @pl.when(j == 0)
    def _init():
        s_ref[...] = jnp.zeros_like(s_ref)
        q_ref[...] = jnp.zeros_like(q_ref)

    row0 = (c * tiles_per_core + j) * tile_rows      # logical (unclamped) tile offset
    row_ids = row0 + jax.lax.broadcasted_iota(jnp.int32, (x_ref.shape[0], 1), 0)
    xb = jnp.where(row_ids < rows_total, x_ref[...].astype(jnp.float32), 0.0)

    # Vector (vreg-row) accumulation into row 0 of this shard's resident block;
    # the final cross-lane reduce happens once, inside the normalize kernel.
    s_ref[0:1, :] = s_ref[0:1, :] + jnp.sum(xb, axis=0, keepdims=True)
    q_ref[0:1, :] = q_ref[0:1, :] + jnp.sum(xb * xb, axis=0, keepdims=True)


def _scale_kernel(x_ref, s_ref, q_ref, w_ref, o_ref, *, total_elems, eps):
    """Streaming pass 2: out = x * (weight / (std + eps)).

    The scalar epilogue is recomputed per grid step from the tiny resident
    (2*_STATS_ROWS, L) partials (XLU/EUP slots are idle; the cost is hidden under
    the HBM stream) so no XLA ops sit between the two pallas_calls and the grid
    axis stays "parallel" (megacore-shardable).  The ragged last output block is
    handled by Pallas' masked writeback.
    """
    n = jnp.float32(total_elems)
    s = jnp.sum(s_ref[...])
    q = jnp.sum(q_ref[...])
    mean = s / n
    var = q / n - mean * mean
    std = jnp.sqrt(jnp.maximum(var, 0.0))
    inv = 1.0 / (std + jnp.float32(eps))
    w_scaled = w_ref[...].astype(jnp.float32) * inv          # (1, L)
    if x_ref.dtype == jnp.float32:
        o_ref[...] = (x_ref[...] * w_scaled).astype(o_ref.dtype)
    else:
        # bf16/low-precision stream: multiply natively (bf16 VALUs on v6e/v7x),
        # halving vreg pressure in the stream.
        o_ref[...] = x_ref[...] * w_scaled.astype(x_ref.dtype)


# -----------------------------------------------------------------------------
# Wrapper
# -----------------------------------------------------------------------------
def layer_norm_pallas(x, weight=None, *, eps=1e-5,
                      max_fused_bytes=None, target_block_bytes=None):
    """LayerNorm forward (batch=None path). x: [N, C]; weight: [C] or None."""
    N, C = x.shape
    dtype = x.dtype
    itemsize = jnp.dtype(dtype).itemsize
    total = N * C

    if weight is None:                       # affine=False -> identity scale
        weight = jnp.ones((C,), dtype)
    assert weight.shape == (C,)

    # ---- generation-aware sizing ------------------------------------------
    vmem = _vmem_capacity_bytes()
    if max_fused_bytes is None:
        max_fused_bytes = vmem // 8          # 16 MiB (v5e/v6e), 8 MiB (v7x), f32 footprint
    if target_block_bytes is None:
        target_block_bytes = vmem // 16      # 8 MiB (v5e/v6e), 4 MiB (v7x) streaming blocks
    vmem_limit = vmem * 3 // 4               # raise scoped VMEM so the blocks fit

    # ---- lane-dense folding (only when it is an exact, pad-free reshape) ----
    fold = math.lcm(C, _LANE) // C
    if fold > 1 and N % fold == 0:
        folded = True
        L = C * fold
        R = N // fold
        xf = x.reshape(R, L)                                  # pure reshape, no padding
        w_row = jnp.tile(weight, fold).reshape(1, L)
    else:
        # Unfolded fallback: correct (full-dim last axis), lane-masked stores when
        # C is not a multiple of 128 and the exact fold is unavailable.
        folded = False
        L, R = C, N
        xf = x
        w_row = weight.reshape(1, C)

    if R * L * 4 <= max_fused_bytes:         # compare against the f32 footprint
        # ---- fast path: whole array in one VMEM block (1 HBM read + 1 write) ----
        out_f = pl.pallas_call(
            functools.partial(_fused_kernel, total_elems=total, eps=eps),
            out_shape=jax.ShapeDtypeStruct((R, L), dtype),
            grid_spec=pltpu.PrefetchScalarGridSpec(
                num_scalar_prefetch=0,
                grid=(1,),
                in_specs=[
                    pl.BlockSpec((R, L), lambda i: (0, 0)),
                    pl.BlockSpec((1, L), lambda i: (0, 0)),
                ],
                out_specs=pl.BlockSpec((R, L), lambda i: (0, 0)),
            ),
            compiler_params=pltpu.CompilerParams(
                dimension_semantics=("arbitrary",),
                vmem_limit_bytes=vmem_limit,
            ),
        )(xf, w_row)
    else:
        # ---- general path: stats streaming kernel + normalize streaming kernel ----
        sub = _sublane_rows(dtype)
        bytes_per_row = L * itemsize
        target_rows = max(sub, _round_down(target_block_bytes // bytes_per_row, sub))
        if R >= sub:
            tile_rows = min(target_rows, _round_down(R, sub))
        else:
            tile_rows = R                    # tiny array: full-dim block is always legal
        n_tiles = pl.cdiv(R, tile_rows)
        tiles_per_core = pl.cdiv(n_tiles, _NUM_CORE_SHARDS)

        def x_stats_map(c, j):
            # Clamp the logical tile index so the DMA never targets a fully
            # out-of-range block; the in-kernel mask (computed from the
            # UNclamped logical index) drops any duplicated tail data.
            return (jnp.minimum(c * tiles_per_core + j, n_tiles - 1), 0)

        sum_part, sq_part = pl.pallas_call(
            functools.partial(_stats_kernel, rows_total=R, tile_rows=tile_rows,
                              tiles_per_core=tiles_per_core),
            out_shape=(
                jax.ShapeDtypeStruct((_NUM_CORE_SHARDS * _STATS_ROWS, L), jnp.float32),
                jax.ShapeDtypeStruct((_NUM_CORE_SHARDS * _STATS_ROWS, L), jnp.float32),
            ),
            grid_spec=pltpu.PrefetchScalarGridSpec(
                num_scalar_prefetch=0,
                grid=(_NUM_CORE_SHARDS, tiles_per_core),
                in_specs=[pl.BlockSpec((tile_rows, L), x_stats_map)],
                out_specs=(
                    pl.BlockSpec((_STATS_ROWS, L), lambda c, j: (c, 0)),
                    pl.BlockSpec((_STATS_ROWS, L), lambda c, j: (c, 0)),
                ),
            ),
            compiler_params=pltpu.CompilerParams(
                dimension_semantics=("parallel", "arbitrary"),
                vmem_limit_bytes=vmem_limit,
            ),
        )(xf)

        out_f = pl.pallas_call(
            functools.partial(_scale_kernel, total_elems=total, eps=eps),
            out_shape=jax.ShapeDtypeStruct((R, L), dtype),
            grid_spec=pltpu.PrefetchScalarGridSpec(
                num_scalar_prefetch=0,
                grid=(n_tiles,),
                in_specs=[
                    pl.BlockSpec((tile_rows, L), lambda i: (i, 0)),
                    pl.BlockSpec((_NUM_CORE_SHARDS * _STATS_ROWS, L), lambda i: (0, 0)),
                    pl.BlockSpec((_NUM_CORE_SHARDS * _STATS_ROWS, L), lambda i: (0, 0)),
                    pl.BlockSpec((1, L), lambda i: (0, 0)),
                ],
                out_specs=pl.BlockSpec((tile_rows, L), lambda i: (i, 0)),
            ),
            compiler_params=pltpu.CompilerParams(
                dimension_semantics=("parallel",),       # megacore-shardable stream
                vmem_limit_bytes=vmem_limit,
            ),
        )(xf, sum_part, sq_part, w_row)

    # ---- unfold back to [N, C] (exact reshape, no slicing) -------------------
    if folded:
        return out_f.reshape(N, C)
    return out_f


def make_weight(in_channels, dtype=jnp.float32):
    # reset_parameters(): fill with 0.5 if in_channels >= 256 else 1.0
    fill = 0.5 if in_channels >= 256 else 1.0
    return jnp.full((in_channels,), fill, dtype=dtype)


if __name__ == "__main__":
    key = jax.random.PRNGKey(0)
    k1, k2, k3, k4 = jax.random.split(key, 4)

    def ref_fn(x, w, eps=1e-5):
        std = jnp.sqrt(jnp.mean((x - jnp.mean(x)) ** 2))   # torch std(unbiased=False)
        return (x / (std + eps)) * w

    # 1) small lane-folded input (C=32 -> 128 lanes) -> fused single-block path.
    x1 = jax.random.normal(k1, (64, 32), dtype=jnp.float32)
    w1 = make_weight(32)
    o1 = jax.block_until_ready(layer_norm_pallas(x1, w1))
    assert jnp.allclose(o1, ref_fn(x1, w1), atol=1e-4, rtol=1e-4), "mismatch (fused, folded)"

    # 2) unfolded streaming path with a ragged tail (fold impossible: 67 % 4 != 0).
    x2 = jax.random.normal(k2, (67, 32), dtype=jnp.float32)
    w2 = make_weight(32)
    o2 = jax.block_until_ready(layer_norm_pallas(x2, w2, max_fused_bytes=0))
    assert jnp.allclose(o2, ref_fn(x2, w2), atol=1e-4, rtol=1e-4), "mismatch (streaming, unfolded)"

    # 3) lcm-based folding for C=48 (folds 8 rows -> 384 lanes), fused path.
    x3 = jax.random.normal(k3, (40, 48), dtype=jnp.float32)
    w3 = make_weight(48)
    o3 = jax.block_until_ready(layer_norm_pallas(x3, w3))
    assert jnp.allclose(o3, ref_fn(x3, w3), atol=1e-4, rtol=1e-4), "mismatch (fused, lcm-folded)"

    # 4) folded streaming path with an odd tile count: exercises the 2-shard stats
    #    grid, the ragged-tail mask and the fully-out-of-range shard clamp.
    x4 = jax.random.normal(k4, (276, 32), dtype=jnp.float32)
    w4 = make_weight(32)
    o4 = jax.block_until_ready(
        layer_norm_pallas(x4, w4, max_fused_bytes=0, target_block_bytes=8 * 128 * 4))
    assert jnp.allclose(o4, ref_fn(x4, w4), atol=1e-4, rtol=1e-4), "mismatch (streaming, sharded)"

    print("KERNEL_OK")
</pallas_src>

<mosaic_0001>
module attributes {stable_mosaic.version = 11 : i64} {
  func.func @_fused_kernel(%arg0: i32, %arg1: memref<16x128xf32, #tpu.memory_space<vmem>>, %arg2: memref<1x128xf32, #tpu.memory_space<vmem>>, %arg3: memref<16x128xf32, #tpu.memory_space<vmem>>) attributes {dimension_semantics = [#tpu.dimension_semantics<arbitrary>], iteration_bounds = array<i64: 1>, scalar_prefetch = 0 : i64, scratch_operands = 0 : i64, tpu.core_type = #tpu.core_type<tc>, window_params = [{pipeline_mode = #tpu.pipeline_mode<synchronous>, transform_indices = @transform_0, window_bounds = array<i64: 16, 128>}, {pipeline_mode = #tpu.pipeline_mode<synchronous>, transform_indices = @transform_1, window_bounds = array<i64: 1, 128>}, {pipeline_mode = #tpu.pipeline_mode<synchronous>, transform_indices = @transform_2, window_bounds = array<i64: 16, 128>}]} {
    %c0 = arith.constant 0 : index
    %c0_0 = arith.constant 0 : index
    %0 = vector.load %arg1[%c0, %c0_0] : memref<16x128xf32, #tpu.memory_space<vmem>>, vector<16x128xf32>
    %1 = vector.shape_cast %0 : vector<16x128xf32> to vector<1x16x128xf32>
    %cst = arith.constant dense<0.000000e+00> : vector<1xf32>
    %2 = vector.multi_reduction <add>, %1, %cst [1, 2] : vector<1x16x128xf32> to vector<1xf32>
    %3 = vector.shape_cast %2 : vector<1xf32> to vector<1x1x1xf32>
    %4 = vector.extract %3[0, 0, 0] : f32 from vector<1x1x1xf32>
    %5 = arith.mulf %0, %0 : vector<16x128xf32>
    %6 = vector.shape_cast %5 : vector<16x128xf32> to vector<1x16x128xf32>
    %cst_1 = arith.constant dense<0.000000e+00> : vector<1xf32>
    %7 = vector.multi_reduction <add>, %6, %cst_1 [1, 2] : vector<1x16x128xf32> to vector<1xf32>
    %8 = vector.shape_cast %7 : vector<1xf32> to vector<1x1x1xf32>
    %9 = vector.extract %8[0, 0, 0] : f32 from vector<1x1x1xf32>
    %cst_2 = arith.constant 2.048000e+03 : f32
    %10 = arith.divf %4, %cst_2 : f32
    %cst_3 = arith.constant 2.048000e+03 : f32
    %11 = arith.divf %9, %cst_3 : f32
    %12 = arith.mulf %10, %10 : f32
    %13 = arith.subf %11, %12 : f32
    %cst_4 = arith.constant 0.000000e+00 : f32
    %14 = arith.maximumf %13, %cst_4 : f32
    %15 = math.sqrt %14 : f32
    %cst_5 = arith.constant 9.99999974E-6 : f32
    %16 = arith.addf %15, %cst_5 : f32
    %cst_6 = arith.constant 1.000000e+00 : f32
    %17 = arith.divf %cst_6, %16 : f32
    %c0_7 = arith.constant 0 : index
    %c0_8 = arith.constant 0 : index
    %18 = vector.load %arg2[%c0_7, %c0_8] : memref<1x128xf32, #tpu.memory_space<vmem>>, vector<1x128xf32>
    %19 = vector.broadcast %17 : f32 to vector<1x128xf32>
    %20 = arith.mulf %18, %19 : vector<1x128xf32>
    %21 = vector.broadcast %20 : vector<1x128xf32> to vector<16x128xf32>
    %22 = arith.mulf %0, %21 : vector<16x128xf32>
    %c0_9 = arith.constant 0 : index
    %c0_10 = arith.constant 0 : index
    %23 = vector.load %arg3[%c0_9, %c0_10] : memref<16x128xf32, #tpu.memory_space<vmem>>, vector<16x128xf32>
    tpu.vector_store %arg3[%c0_9, %c0_10], %22 {strides = array<i32>} : memref<16x128xf32, #tpu.memory_space<vmem>>, vector<16x128xf32>,
    return
  }
  func.func @transform_0(%arg0: i32) -> (i32, i32) {
    %c0_i32 = arith.constant 0 : i32
    %c0_i32_0 = arith.constant 0 : i32
    %c0_i32_1 = arith.constant 0 : i32
    return %c0_i32, %c0_i32_0 : i32, i32
  }
  func.func @transform_1(%arg0: i32) -> (i32, i32) {
    %c0_i32 = arith.constant 0 : i32
    %c0_i32_0 = arith.constant 0 : i32
    %c0_i32_1 = arith.constant 0 : i32
    return %c0_i32, %c0_i32_0 : i32, i32
  }
  func.func @transform_2(%arg0: i32) -> (i32, i32) {
    %c0_i32 = arith.constant 0 : i32
    %c0_i32_0 = arith.constant 0 : i32
    %c0_i32_1 = arith.constant 0 : i32
    return %c0_i32, %c0_i32_0 : i32, i32
  }
}

</mosaic_0001>

<bundles_post_ra>
// kernel: tpu_custom_call.1
= control target key start
LH: loop header
LB: loop body
LE: loop exit
PB: predicated region body
PF: predicated region fallthrough
CT: control target
= control target key end

     0   :  { %7 = vsyncpa [#allocation3], 0  ;;  %s220_s0 = inlined_call_operand.hbm [shape: f32[16,128], index: 0, kind: input, shape index: {}]   ;;  %s221_s1 = inlined_call_operand.vmem [shape: f32[1,128], index: 1, kind: input, shape index: {}]   ;;  %s222_s2 = inlined_call_operand.hbm [shape: f32[16,128], index: 2, kind: output, shape index: {}]  }
   0x1   :  { %8 = vsyncpa [#allocation4], 0  ;;  %s167_s9 = smov [#allocation2]   ;;  %s119_s13 = scalar_lea.hbm %s220_s0, 256 }
   0x2   :  { %s14_s10 = sshll.u32 %s167_s9, 4  ;;  %p120_p0 = scmp.ne.s32.totalorder %s220_s0, %s119_s13  ;;  %s15_s10 = int_to_ptr.vmem [resolvable:$true] %s14_s10 }
   0x3   :  { %p123_p1 = scmp.lt.u32.totalorder %s119_s13, %s220_s0 }
   0x5   :  { %p125_p2 = pnand %p123_p1, %p120_p0 }
   0x7   :  { %128 = shalt.err (!%p125_p2)
}
   0x8   :  { %s129_s18 = scalar_lea.vmem %s15_s10, 256  ;;  %p134_p4 = scmp.lt.s32.totalorder %s15_s10, %s15_s10 }
   0x9   :  { %p130_p3 = scmp.ne.s32.totalorder %s15_s10, %s129_s18  ;;  %p135_p5 = scmp.lt.s32.totalorder %s129_s18, %s129_s18 }
   0xb   :  { %p136_p6 = por %p135_p5, %p134_p4 }
   0xd   :  { %p137_p7 = pnand %p136_p6, %p130_p3 }
   0xf   :  { %140 = shalt.err (!%p137_p7)
}
  0x10   :  { %s168_s19 = smov 128   ;;  %s169_s20 = smov 8  }
  0x11   :  { %20 = dma.hbm_to_vmem [thread:$0]  %s220_s0, 256, %s15_s10, [#allocation3], %s168_s19, %s168_s19, %s169_s20  }
  0x12   :  { %163 = dma.done.wait [#allocation3], 256  }
  0x13   :  { %164 = vsyncadd [#allocation3], 4294967040  ;;  %v26_v0 = vld [vmem:[#allocation2] sm:$0xff]  ;;  %v27_v1 = vld [vmem:[#allocation2 + $0x8] sm:$0xff]  ;;  %s170_s28 = smov 0.0   ;;  %v76_v28 = vlaneseq  ;;  %s171_s7 = smov [#allocation5]  }
  0x14   :  { %v28_v2 = vadd.f32 %v27_v1, %v26_v0  ;;  %v38_v3 = vmul.f32 %v26_v0, %v26_v0  ;;  %v39_v4 = vmul.f32 %v27_v1, %v27_v1  ;;  %v72_v30 = vld [vmem:[%s221_s1] sm:$0x1]  ;;  %s90_s8 = sshll.u32 %s171_s7, 4  ;;  %s91_s8 = int_to_ptr.vmem [resolvable:$true] %s90_s8 }
  0x15   :  { %v77_v29 = vshrl.u32 %v76_v28, 7  ;;  %s141_s9 = scalar_lea.vmem %s91_s8, 256  ;;  %p146_p9 = scmp.lt.s32.totalorder %s91_s8, %s91_s8 }
  0x16   :  { %29 = vadd.xlane.f32.xlu0 %v28_v2  ;;  %v40_v5 = vadd.f32 %v39_v4, %v38_v3  ;;  %p142_p8 = scmp.ne.s32.totalorder %s91_s8, %s141_s9  ;;  %p147_p10 = scmp.lt.s32.totalorder %s141_s9, %s141_s9 }
  0x17   :  { %v78_v31 = vsub.s32 0, %v77_v29 }
  0x18   :  { %p148_p11 = por %p147_p10, %p146_p9 }
  0x1a   :  { %41 = vadd.xlane.f32.xlu0 %v40_v5  ;;  %p149_p12 = pnand %p148_p11, %p142_p8 }
  0xa3   :  { %v30_v6 = vpop.xlane.xlu0 %29 }
  0xa4   :  { %v31_v7 = vrot.slane %v30_v6, 4 }
  0xa6   :  { %v32_v8 = vadd.f32 %v31_v7, %v30_v6 }
  0xa7   :  { %v42_v9 = vpop.xlane.xlu0 %41 }
  0xa8   :  { %v33_v10 = vrot.slane %v32_v8, 2  ;;  %v43_v11 = vrot.slane %v42_v9, 4 }
  0xaa   :  { %v44_v12 = vadd.f32 %v43_v11, %v42_v9  ;;  %v34_v13 = vadd.f32 %v33_v10, %v32_v8 }
  0xac   :  { %v45_v14 = vrot.slane %v44_v12, 2  ;;  %v35_v15 = vrot.slane %v34_v13, 1 }
  0xae   :  { %v46_v16 = vadd.f32 %v45_v14, %v44_v12  ;;  %v36_v17 = vadd.f32 %v35_v15, %v34_v13 }
  0xb0   :  { %102 = vpush %v36_v17  ;;  %v47_v18 = vrot.slane %v46_v16, 1 }
  0xb2   :  { %v48_v19 = vadd.f32 %v47_v18, %v46_v16 }
  0xb4   :  { %104 = vpush %v48_v19 }
  0xe1   :  { %s103_s0 = spop %102 }
  0xe2   :  { %s52_s23 = smul.f32 0.00048828125, %s103_s0 }
  0xe4   :  { %s56_s24 = smul.f32 %s52_s23, %s52_s23 }
  0xe5   :  { %s105_s25 = spop %104 }
  0xe6   :  { %s55_s26 = smul.f32 0.00048828125, %s105_s25 }
  0xe8   :  { %s57_s27 = ssub.f32 %s55_s26, %s56_s24 }
  0xea   :  { %s58_s29 = smax.f32 %s170_s28, %s57_s27 }
  0xeb   :  { %v59_v20 = vstv %s58_s29 }
  0xec   :  { %115 = vrsqrt.f32 %v59_v20  ;;  %vm62_vm0 = vcmp.eq.f32.partialorder %v59_v20, inf  ;;  %v65_v23 = vand.u32 2147483648, %v59_v20  ;;  %vm64_vm1 = vcmp.eq.f32.partialorder %v59_v20, 0.0 }
  0xf6   :  { %v116_v21 = vpop.eup %115 }
  0xf7   :  { %v61_v22 = vmul.f32 %v116_v21, %v59_v20 }
  0xf9   :  { %v63_v24 = vsel %vm62_vm0, %v59_v20, %v61_v22 }
  0xfa   :  { %v66_v25 = vsel %vm64_vm1, %v65_v23, %v63_v24 }
  0xfb   :  { %106 = vpush %v66_v25 }
 0x12c   :  { %s107_s30 = spop %106 }
 0x12d   :  { %s68_s3 = sadd.f32 1e-05, %s107_s30 }
 0x12f   :  { %v69_v26 = vstv %s68_s3 }
 0x130   :  { %117 = vrcp.f32 %v69_v26 }
 0x13a   :  { %v118_v27 = vpop.eup %117 }
 0x13b   :  { %108 = vpush %v118_v27 }
 0x16c   :  { %s109_s6 = spop %108 }
 0x16d   :  { %v73_v32 = vstv %s109_s6 }
 0x16e   :  { %v74_v33 = vmul.f32 %v73_v32, %v72_v30 }
 0x170   :  { %v79_v34 = vrot.slane %v74_v33, %v78_v31 }
 0x172   :  { %v81_v35 = vmul.f32 %v79_v34, %v26_v0  ;;  %v82_v36 = vmul.f32 %v79_v34, %v27_v1 }
 0x174   :  { %83 = vst [vmem:[#allocation5] sm:$0xff] %v81_v35  ;;  %84 = vst [vmem:[#allocation5 + $0x8] sm:$0xff] %v82_v36 }
 0x175   :  { %152 = shalt.err (!%p149_p12)
}
 0x176   :  { %s153_s11 = scalar_lea.hbm %s222_s2, 256 }
 0x177   :  { %p154_p13 = scmp.ne.s32.totalorder %s222_s2, %s153_s11  ;;  %p157_p0 = scmp.lt.u32.totalorder %s153_s11, %s222_s2 }
 0x179   :  { %p159_p1 = pnand %p157_p0, %p154_p13 }
 0x17b   :  { %162 = shalt.err (!%p159_p1)
}
 0x17c   :  { %96 = dma.vmem_to_hbm [thread:$0]  %s91_s8, 256, %s222_s2, [#allocation4], %s168_s19, %s168_s19, %s169_s20  }
 0x17d   :  { %165 = dma.done.wait [#allocation4], 256  }
 0x17e   :  { %166 = vsyncadd [#allocation4], 4294967040 }
 0x17f   :  { %100 = vsyncpa [#allocation3], 1 }
 0x180   :  { %101 = vsyncpa [#allocation4], 1 }

</bundles_post_ra>
